<compile_context>
chip_gen: v5e
topology: v5e:2x2
jax: 0.10.0
libtpu: 0.0.40
codegen_flags: <defaults>
</compile_context>

<pallas_src>
import functools

import jax
import jax.numpy as jnp
from jax.experimental import pallas as pl
from jax.experimental.pallas import tpu as pltpu


def _round_up(v: int, m: int) -> int:
    return ((v + m - 1) // m) * m


def dqn_kernel(x_ref, w1_ref, b1_ref, w2_ref, b2_ref, o_ref):
    # Layer 1: (TB, K) @ (K, H_pad) on the MXU, f32 accumulation; bias + ReLU
    # on the VPU in f32 (also avoids emulated bf16 VPU ops on v5e).
    h = jnp.dot(x_ref[...], w1_ref[...], preferred_element_type=jnp.float32)
    h = jnp.maximum(h + b1_ref[...], 0.0)
    # Layer 2: (TB, H_pad) @ (H_pad, A_pad), f32 accumulation, f32 bias.
    q = jnp.dot(h.astype(w2_ref.dtype), w2_ref[...],
                preferred_element_type=jnp.float32) + b2_ref[...]
    # Only the real action columns go back to HBM (A << A_pad); padded columns
    # never leave VMEM.
    o_ref[...] = q[:, : o_ref.shape[-1]].astype(o_ref.dtype)


def prepare_dqn_params(w1, b1, w2, b2):
    """Pad weights/biases ONCE to lane-friendly widths (outside the hot path).

    w1: [K, H], b1: [1, H], w2: [H, A], b2: [1, A].
    Padding is exact: padded hidden columns produce relu(0 + 0) = 0 and padded
    W2 rows/cols are 0, so real outputs are unchanged.
    """
    K, H = w1.shape
    A = w2.shape[1]
    H_pad = _round_up(H, 128)   # lane-dense hidden width for the MXU
    A_pad = _round_up(A, 128)   # keep W2/b2 MXU-friendly; output itself stays narrow

    w1p = jnp.zeros((K, H_pad), jnp.float32).at[:, :H].set(w1.astype(jnp.float32))
    b1p = jnp.zeros((1, H_pad), jnp.float32).at[:, :H].set(b1.astype(jnp.float32))
    w2p = jnp.zeros((H_pad, A_pad), jnp.float32).at[:H, :A].set(w2.astype(jnp.float32))
    b2p = jnp.zeros((1, A_pad), jnp.float32).at[:, :A].set(b2.astype(jnp.float32))
    return w1p, b1p, w2p, b2p


def _pick_batch_tile(B: int, block_batch: int) -> int:
    """Batch tile: multiple of 8 sublanes, large enough to amortize per-step
    overhead, but split so the grid keeps >= 2 steps on big batches (v7x has
    2 TensorCores sharding the 'parallel' axis)."""
    TB = _round_up(max(1, min(block_batch, B)), 8)
    if pl.cdiv(B, TB) < 2 and B > 16:
        TB = _round_up(pl.cdiv(B, 2), 8)
    return TB


@functools.partial(jax.jit, static_argnames=("num_actions", "block_batch"))
def dqn_forward(x, w1p, b1p, w2p, b2p, *, num_actions, block_batch=4096):
    """x: [B, state_dim] (unpadded, used as-is), padded params from
    prepare_dqn_params -> [B, num_actions]."""
    B, K = x.shape
    H_pad = w1p.shape[1]
    A_pad = w2p.shape[1]
    A = num_actions
    out_dtype = x.dtype

    TB = _pick_batch_tile(B, block_batch)
    grid = (pl.cdiv(B, TB),)   # ragged edge block handled by Pallas masking

    cost = pl.CostEstimate(
        flops=2 * B * (K * H_pad + H_pad * A_pad),
        transcendentals=0,
        bytes_accessed=4 * (B * K + B * A + K * H_pad + H_pad * A_pad + H_pad + A_pad),
    )

    return pl.pallas_call(
        dqn_kernel,
        out_shape=jax.ShapeDtypeStruct((B, A), out_dtype),
        grid=grid,
        in_specs=[
            # Activations: tiled along batch; last dim == full array dim (legal
            # BlockSpec), DMA only moves the real K columns.
            pl.BlockSpec((TB, K), lambda i: (i, 0)),
            # Weights/biases: full blocks, constant index_map -> resident in
            # VMEM across all grid steps (tiny, so no need for pl.Buffered(1)).
            pl.BlockSpec((K, H_pad), lambda i: (0, 0)),
            pl.BlockSpec((1, H_pad), lambda i: (0, 0)),
            pl.BlockSpec((H_pad, A_pad), lambda i: (0, 0)),
            pl.BlockSpec((1, A_pad), lambda i: (0, 0)),
        ],
        # Narrow output: last dim == full array dim (num_actions), so no
        # 128-lane padded writeback to HBM.
        out_specs=pl.BlockSpec((TB, A), lambda i: (i, 0)),
        compiler_params=pltpu.CompilerParams(
            dimension_semantics=("parallel",),      # shard batch across TCs (v7x)
            vmem_limit_bytes=48 * 1024 * 1024,      # headroom for TB up to ~8192
        ),
        cost_estimate=cost,
    )(x, w1p, b1p, w2p, b2p)


def init_dqn_params(key, num_actions, hidden_dim, num_time_steps,
                    dtype=jnp.float32):
    """Deterministic init matching PyTorch nn.Linear default (U(-1/sqrt(fan_in)))."""
    state_dim = num_actions * num_time_steps
    k1, k2, k3, k4 = jax.random.split(key, 4)

    bound1 = 1.0 / jnp.sqrt(state_dim)
    w1 = jax.random.uniform(k1, (state_dim, hidden_dim), dtype,
                            minval=-bound1, maxval=bound1)
    b1 = jax.random.uniform(k2, (1, hidden_dim), dtype,
                            minval=-bound1, maxval=bound1)

    bound2 = 1.0 / jnp.sqrt(hidden_dim)
    w2 = jax.random.uniform(k3, (hidden_dim, num_actions), dtype,
                            minval=-bound2, maxval=bound2)
    b2 = jax.random.uniform(k4, (1, num_actions), dtype,
                            minval=-bound2, maxval=bound2)
    return w1, b1, w2, b2


if __name__ == "__main__":
    # Shapes consistent with the module (prisoner's-dilemma style DQN).
    num_agents = 2          # unused by forward()
    num_actions = 2
    num_time_steps = 4
    hidden_dim = 32
    state_dim = num_actions * num_time_steps   # 8

    key = jax.random.PRNGKey(0)
    kx, kp, kb = jax.random.split(key, 3)
    w1, b1, w2, b2 = init_dqn_params(kp, num_actions, hidden_dim, num_time_steps)

    # Pad weights ONCE, outside the hot path.
    w1p, b1p, w2p, b2p = prepare_dqn_params(w1, b1, w2, b2)
    w1p, b1p, w2p, b2p = jax.block_until_ready((w1p, b1p, w2p, b2p))

    def ref_forward(x):
        return jnp.maximum(x @ w1 + b1, 0.0) @ w2 + b2

    # --- Small check (batch=2) ------------------------------------------------
    batch = 2
    x_small = jax.random.normal(kx, (batch, state_dim), jnp.float32)
    q_small = dqn_forward(x_small, w1p, b1p, w2p, b2p, num_actions=num_actions)
    jax.block_until_ready(q_small)
    assert q_small.shape == (batch, num_actions)
    assert jnp.allclose(q_small, ref_forward(x_small), atol=1e-5, rtol=1e-5)

    # --- Ragged batch exercising a multi-step grid (edge-block masking) -------
    big_batch = 520  # not a multiple of 8 or of the tile -> >=2 steps + ragged edge
    x_big = jax.random.normal(kb, (big_batch, state_dim), jnp.float32)
    q_big = dqn_forward(x_big, w1p, b1p, w2p, b2p, num_actions=num_actions)
    jax.block_until_ready(q_big)
    assert q_big.shape == (big_batch, num_actions)
    assert jnp.allclose(q_big, ref_forward(x_big), atol=1e-5, rtol=1e-5)

    # --- Larger batch with an explicit big tile (>=2 grid steps kept) ---------
    huge_batch = 4096
    x_huge = jax.random.normal(jax.random.PRNGKey(1), (huge_batch, state_dim),
                               jnp.float32)
    q_huge = dqn_forward(x_huge, w1p, b1p, w2p, b2p,
                         num_actions=num_actions, block_batch=4096)
    jax.block_until_ready(q_huge)
    assert q_huge.shape == (huge_batch, num_actions)
    assert jnp.allclose(q_huge, ref_forward(x_huge), atol=1e-4, rtol=1e-4)

    print("KERNEL_OK")
</pallas_src>

<mosaic_0001>
module attributes {stable_mosaic.version = 11 : i64} {
  func.func @dqn_kernel(%arg0: i32, %arg1: memref<8x8xf32, #tpu.memory_space<vmem>>, %arg2: memref<8x128xf32, #tpu.memory_space<vmem>>, %arg3: memref<1x128xf32, #tpu.memory_space<vmem>>, %arg4: memref<128x128xf32, #tpu.memory_space<vmem>>, %arg5: memref<1x128xf32, #tpu.memory_space<vmem>>, %arg6: memref<8x2xf32, #tpu.memory_space<vmem>>) attributes {dimension_semantics = [#tpu.dimension_semantics<parallel>], iteration_bounds = array<i64: 1>, scalar_prefetch = 0 : i64, scratch_operands = 0 : i64, tpu.core_type = #tpu.core_type<tc>, window_params = [{transform_indices = @transform_0, window_bounds = array<i64: 8, 8>}, {pipeline_mode = #tpu.pipeline_mode<synchronous>, transform_indices = @transform_1, window_bounds = array<i64: 8, 128>}, {pipeline_mode = #tpu.pipeline_mode<synchronous>, transform_indices = @transform_2, window_bounds = array<i64: 1, 128>}, {pipeline_mode = #tpu.pipeline_mode<synchronous>, transform_indices = @transform_3, window_bounds = array<i64: 128, 128>}, {pipeline_mode = #tpu.pipeline_mode<synchronous>, transform_indices = @transform_4, window_bounds = array<i64: 1, 128>}, {transform_indices = @transform_5, window_bounds = array<i64: 8, 2>}]} {
    %c0 = arith.constant 0 : index
    %c0_0 = arith.constant 0 : index
    %0 = vector.load %arg1[%c0, %c0_0] : memref<8x8xf32, #tpu.memory_space<vmem>>, vector<8x8xf32>
    %c0_1 = arith.constant 0 : index
    %c0_2 = arith.constant 0 : index
    %1 = vector.load %arg2[%c0_1, %c0_2] : memref<8x128xf32, #tpu.memory_space<vmem>>, vector<8x128xf32>
    %cst = arith.constant dense<0.000000e+00> : vector<8x128xf32>
    %2 = tpu.matmul %0, %1, %cst {dimension_numbers = #tpu.dot_dimension_numbers<[1], [0], [0], [1], [0, 0, 1, 1], [], []>} : vector<8x8xf32>, vector<8x128xf32>, vector<8x128xf32> -> vector<8x128xf32>
    %c0_3 = arith.constant 0 : index
    %c0_4 = arith.constant 0 : index
    %3 = vector.load %arg3[%c0_3, %c0_4] : memref<1x128xf32, #tpu.memory_space<vmem>>, vector<1x128xf32>
    %4 = vector.broadcast %3 : vector<1x128xf32> to vector<8x128xf32>
    %5 = arith.addf %2, %4 : vector<8x128xf32>
    %cst_5 = arith.constant 0.000000e+00 : f32
    %6 = vector.broadcast %cst_5 : f32 to vector<8x128xf32>
    %7 = arith.maximumf %5, %6 : vector<8x128xf32>
    %c0_6 = arith.constant 0 : index
    %c0_7 = arith.constant 0 : index
    %8 = vector.load %arg4[%c0_6, %c0_7] : memref<128x128xf32, #tpu.memory_space<vmem>>, vector<128x128xf32>
    %cst_8 = arith.constant dense<0.000000e+00> : vector<8x128xf32>
    %9 = tpu.matmul %7, %8, %cst_8 {dimension_numbers = #tpu.dot_dimension_numbers<[1], [0], [0], [1], [0, 0, 1, 1], [], []>} : vector<8x128xf32>, vector<128x128xf32>, vector<8x128xf32> -> vector<8x128xf32>
    %c0_9 = arith.constant 0 : index
    %c0_10 = arith.constant 0 : index
    %10 = vector.load %arg5[%c0_9, %c0_10] : memref<1x128xf32, #tpu.memory_space<vmem>>, vector<1x128xf32>
    %11 = vector.broadcast %10 : vector<1x128xf32> to vector<8x128xf32>
    %12 = arith.addf %9, %11 : vector<8x128xf32>
    %13 = vector.extract_strided_slice %12 {offsets = [0, 0], sizes = [8, 2], strides = [1, 1]} : vector<8x128xf32> to vector<8x2xf32>
    %c0_11 = arith.constant 0 : index
    %c0_12 = arith.constant 0 : index
    %14 = vector.load %arg6[%c0_11, %c0_12] : memref<8x2xf32, #tpu.memory_space<vmem>>, vector<8x2xf32>
    tpu.vector_store %arg6[%c0_11, %c0_12], %13 {strides = array<i32>} : memref<8x2xf32, #tpu.memory_space<vmem>>, vector<8x2xf32>,
    return
  }
  func.func @transform_0(%arg0: i32) -> (i32, i32) {
    %c0_i32 = arith.constant 0 : i32
    %c0_i32_0 = arith.constant 0 : i32
    return %arg0, %c0_i32 : i32, i32
  }
  func.func @transform_1(%arg0: i32) -> (i32, i32) {
    %c0_i32 = arith.constant 0 : i32
    %c0_i32_0 = arith.constant 0 : i32
    %c0_i32_1 = arith.constant 0 : i32
    return %c0_i32, %c0_i32_0 : i32, i32
  }
  func.func @transform_2(%arg0: i32) -> (i32, i32) {
    %c0_i32 = arith.constant 0 : i32
    %c0_i32_0 = arith.constant 0 : i32
    %c0_i32_1 = arith.constant 0 : i32
    return %c0_i32, %c0_i32_0 : i32, i32
  }
  func.func @transform_3(%arg0: i32) -> (i32, i32) {
    %c0_i32 = arith.constant 0 : i32
    %c0_i32_0 = arith.constant 0 : i32
    %c0_i32_1 = arith.constant 0 : i32
    return %c0_i32, %c0_i32_0 : i32, i32
  }
  func.func @transform_4(%arg0: i32) -> (i32, i32) {
    %c0_i32 = arith.constant 0 : i32
    %c0_i32_0 = arith.constant 0 : i32
    %c0_i32_1 = arith.constant 0 : i32
    return %c0_i32, %c0_i32_0 : i32, i32
  }
  func.func @transform_5(%arg0: i32) -> (i32, i32) {
    %c0_i32 = arith.constant 0 : i32
    %c0_i32_0 = arith.constant 0 : i32
    return %arg0, %c0_i32 : i32, i32
  }
}

</mosaic_0001>

<bundles_post_ra>
// kernel: dqn_forward.1
= control target key start
LH: loop header
LB: loop body
LE: loop exit
PB: predicated region body
PF: predicated region fallthrough
CT: control target
= control target key end

     0   :  { %10 = vsyncpa [#allocation3], 0  ;;  %s334_s0 = inlined_call_operand.hbm [shape: f32[2,8], index: 0, kind: input, shape index: {}]   ;;  %s335_s1 = inlined_call_operand.hbm [shape: f32[8,128], index: 1, kind: input, shape index: {}]   ;;  %s336_s2 = inlined_call_operand.vmem [shape: f32[1,128], index: 2, kind: input, shape index: {}]   ;;  %s337_s3 = inlined_call_operand.hbm [shape: f32[128,128], index: 3, kind: input, shape index: {}]   ;;  %s338_s4 = inlined_call_operand.vmem [shape: f32[1,128], index: 4, kind: input, shape index: {}]   ;;  %s339_s5 = inlined_call_operand.hbm [shape: f32[2,2], index: 5, kind: output, shape index: {}]  }
   0x1   :  { %11 = vsyncpa [#allocation6], 0 }
   0x2   :  { %12 = vsyncpa [#allocation4], 0  ;;  %s31_s20 = sshll.u32 %s335_s1, 4  ;;  %s32_s20 = int_to_ptr.hbm [resolvable:$true] %s31_s20 }
   0x3   :  { %16 = vsyncadd [#allocation3], 96  ;;  %s272_s21 = smov [#allocation5]   ;;  %s17_s25 = sshll.u32 %s334_s0, 4  ;;  %s18_s25 = int_to_ptr.hbm [resolvable:$true] %s17_s25 }
   0x4   :  { %s33_s22 = sshll.u32 %s272_s21, 4  ;;  %s273_s26 = smov [#allocation2]   ;;  %s34_s22 = int_to_ptr.vmem [resolvable:$true] %s33_s22 }
   0x5   :  { %36 = dma.hbm_to_vmem [thread:$0]  %s32_s20, 128, %s34_s22, [#allocation6]  }
   0x6   :  { %s19_s27 = sshll.u32 %s273_s26, 4  ;;  %s274_s28 = smov 32   ;;  %s20_s27 = int_to_ptr.vmem [resolvable:$true] %s19_s27 }
   0x7   :  { %s275_s29 = smov 2   ;;  %s43_s6 = sshll.u32 %s337_s3, 4  ;;  %s44_s6 = int_to_ptr.hbm [resolvable:$true] %s43_s6 }
   0x8   :  { %25 = dma.hbm_to_vmem [thread:$0]  %s18_s25, 32, %s20_s27, [#allocation3], %s274_s28, %s274_s28, %s275_s29  }
   0x9   :  { %s276_s7 = smov [#allocation7]   ;;  %s277_s0 = smov 128  }
   0xa   :  { %s45_s8 = sshll.u32 %s276_s7, 4  ;;  %s278_s9 = smov 8   ;;  %s46_s8 = int_to_ptr.vmem [resolvable:$true] %s45_s8 }
   0xb   :  { %51 = dma.hbm_to_vmem [thread:$0]  %s44_s6, 2048, %s46_s8, [#allocation6], %s277_s0, %s277_s0, %s278_s9  }
   0xc   :  { %266 = dma.done.wait [#allocation3], 128  }
   0xd   :  { %267 = vsyncadd [#allocation3], 4294967168 }
   0xe   :  { %268 = dma.done.wait [#allocation6], 2176  }
   0xf   :  { %269 = vsyncadd [#allocation6], 4294965120  ;;  %vm72_vm0 = vcmask 64512   ;;  %v67_v0 = vld [vmem:[#allocation5] sm:$0xff]  ;;  %v66_v1 = vld [vmem:[#allocation2] sm:$0xff]  ;;  %vm137_vm1 = vcmask 15360  }
  0x10   :  { %v112_v2 = vld [vmem:[#allocation7 + $0x78] sm:$0xff]  ;;  %91 = vmatpush.msra.mxu0 %v67_v0  ;;  %v111_v3 = vld [vmem:[#allocation7 + $0x70] sm:$0xff]  ;;  %v110_v4 = vld [vmem:[#allocation7 + $0x68] sm:$0xff] }
  0x11   :  { %117 = vmatpush.msra.mxu1 %v112_v2  ;;  %159 = vmatmul.msk.f32.vlgmr.msra.gmra.mxu0 %vm72_vm0, %v66_v1  ;;  %v109_v5 = vld [vmem:[#allocation7 + $0x60] sm:$0xff]  ;;  %v108_v6 = vld [vmem:[#allocation7 + $0x58] sm:$0xff]  ;;  %v107_v7 = vld [vmem:[#allocation7 + $0x50] sm:$0xff] }
  0x12   :  { %v106_v8 = vld [vmem:[#allocation7 + $0x48] sm:$0xff]  ;;  %v105_v9 = vld [vmem:[#allocation7 + $0x40] sm:$0xff]  ;;  %v104_v10 = vld [vmem:[#allocation7 + $0x38] sm:$0xff] }
  0x13   :  { %118 = vmatpush.msra.mxu1 %v111_v3  ;;  %v103_v11 = vld [vmem:[#allocation7 + $0x30] sm:$0xff]  ;;  %v102_v12 = vld [vmem:[#allocation7 + $0x28] sm:$0xff]  ;;  %v101_v13 = vld [vmem:[#allocation7 + $0x20] sm:$0xff] }
  0x14   :  { %v100_v14 = vld [vmem:[#allocation7 + $0x18] sm:$0xff]  ;;  %v99_v15 = vld [vmem:[#allocation7 + $0x10] sm:$0xff]  ;;  %v98_v16 = vld [vmem:[#allocation7 + $0x8] sm:$0xff] }
  0x15   :  { %119 = vmatpush.msra.mxu1 %v110_v4  ;;  %v97_v17 = vld [vmem:[#allocation7] sm:$0xff]  ;;  %v168_v18 = vld [vmem:[%s336_s2] ss:$0 sm:$0xff] }
  0x16   :  { %v169_v22 = vld [vmem:[%s338_s4] ss:$0 sm:$0xff] }
  0x17   :  { %120 = vmatpush.msra.mxu1 %v109_v5 }
  0x19   :  { %121 = vmatpush.msra.mxu1 %v108_v6 }
  0x1b   :  { %122 = vmatpush.msra.mxu1 %v107_v7 }
  0x1d   :  { %123 = vmatpush.msra.mxu1 %v106_v8 }
  0x1f   :  { %124 = vmatpush.msra.mxu1 %v105_v9 }
  0x21   :  { %125 = vmatpush.msra.mxu1 %v104_v10 }
  0x23   :  { %126 = vmatpush.msra.mxu1 %v103_v11 }
  0x25   :  { %127 = vmatpush.msra.mxu1 %v102_v12 }
  0x27   :  { %128 = vmatpush.msra.mxu1 %v101_v13 }
  0x29   :  { %129 = vmatpush.msra.mxu1 %v100_v14 }
  0x2b   :  { %130 = vmatpush.msra.mxu1 %v99_v15 }
  0x2d   :  { %131 = vmatpush.msra.mxu1 %v98_v16 }
  0x2f   :  { %132 = vmatpush.msra.mxu1 %v97_v17 }
  0x8e   :  { %v93_v19 = vpop.f32.mrf.mxu0 }
  0x8f   :  { %v94_v20 = vadd.f32 %v168_v18, %v93_v19 }
  0x91   :  { %v96_v21 = vmax.f32 %v94_v20, 0.0 }
  0x93   :  { %133 = vmatmul.f32.vlgmr.msra.gmra.mxu1 %v96_v21 }
 0x110   :  { %v134_v23 = vpop.f32.mrf.mxu1 }
 0x111   :  { %v135_v24 = vadd.f32 %v169_v22, %v134_v23 }
 0x113   :  { %138 = vst.msk [vmem:[#allocation8] sm:$0xff] %vm137_vm1, %v135_v24 }
 0x114   :  { %142 = vsyncadd [#allocation4], 96  ;;  %s145_s15 = sshll.u32 %s339_s5, 4  ;;  %s279_s16 = smov [#allocation8]   ;;  %s146_s15 = int_to_ptr.hbm [resolvable:$true] %s145_s15 }
 0x115   :  { %s143_s17 = sshll.u32 %s279_s16, 4  ;;  %s144_s17 = int_to_ptr.vmem [resolvable:$true] %s143_s17 }
 0x116   :  { %151 = dma.vmem_to_hbm [thread:$0]  %s144_s17, 32, %s146_s15, [#allocation4], %s274_s28, %s274_s28, %s275_s29  }
 0x117   :  { %270 = dma.done.wait [#allocation4], 128  }
 0x118   :  { %271 = vsyncadd [#allocation4], 4294967168 }
 0x119   :  { %156 = vsyncpa [#allocation3], 1 }
 0x11a   :  { %157 = vsyncpa [#allocation6], 1 }
 0x11b   :  { %158 = vsyncpa [#allocation4], 1 }

</bundles_post_ra>
